<compile_context>
chip_gen: v6e
topology: v6e:2x2x1
jax: 0.10.0
libtpu: 0.0.40
codegen_flags: <defaults>
</compile_context>

<pallas_src>
import jax
import jax.numpy as jnp
from jax.experimental import pallas as pl
from jax.experimental.pallas import tpu as pltpu


def _attention_kernel(hproj_ref, enc_ref, w2_ref, v_ref, out_ref):
    # hproj_ref : (TB, H)    precomputed hidden @ W1^T + bias
    # enc_ref   : (TB, S, H) encoder outputs for this batch tile
    # w2_ref    : (H, H)     W2^T (acts on encoder outputs), grid-resident
    # v_ref     : (1, H)     v weight (Linear(H -> 1), no bias), grid-resident
    # out_ref   : (TB, H)    context vectors (lane-dense output slab)
    TB, S, H = enc_ref.shape

    enc = enc_ref[...]                                        # (TB, S, H)

    # Fused encoder projection: one (TB*S, H) @ (H, H) MXU matmul.
    e_proj = jnp.dot(enc.reshape(TB * S, H), w2_ref[...],
                     preferred_element_type=jnp.float32)      # (TB*S, H)

    # energy = tanh(h_proj + enc_proj)   (bias already folded into h_proj)
    energy = jnp.tanh(e_proj.reshape(TB, S, H)
                      + hproj_ref[...][:, None, :])           # (TB, S, H)

    # scores = energy @ v^T, done as a lane reduction (avoids an N=1 matmul)
    scores = jnp.sum(energy * v_ref[...][None], axis=2)       # (TB, S)

    # softmax over the sequence (lane) axis
    m = jnp.max(scores, axis=1, keepdims=True)                # (TB, 1)
    ex = jnp.exp(scores - m)                                  # (TB, S)
    inv = pl.reciprocal(jnp.sum(ex, axis=1, keepdims=True), approx=True)
    attn = ex * inv                                           # (TB, S)

    # context[b, :] = sum_s attn[b, s] * enc[b, s, :]
    ctx = jnp.sum(attn[:, :, None] * enc, axis=1)             # (TB, H)
    out_ref[...] = ctx.astype(out_ref.dtype)


def attention_pallas(hidden, encoder_outputs, wa, ba, vw, *, block_b=8):
    """hidden: (B,H), encoder_outputs: (B,S,H).
    wa: (H, 2H) PyTorch-layout attn weight; ba: (H,); vw: (1, H)."""
    B, H = hidden.shape
    _, S, _ = encoder_outputs.shape

    wa = jnp.asarray(wa, jnp.float32)
    w1_t = wa[:, :H].T                                        # (H, H): hidden half
    w2_t = wa[:, H:].T                                        # (H, H): encoder half
    ba_2d = jnp.asarray(ba, jnp.float32).reshape(1, H)
    v_2d = jnp.asarray(vw, jnp.float32).reshape(1, H)

    # Hoisted hidden projection: one (B,H)@(H,H) matmul outside the grid loop,
    # with the bias folded in.
    hproj = jnp.dot(hidden.astype(jnp.float32), w1_t,
                    preferred_element_type=jnp.float32) + ba_2d   # (B, H)
    enc = encoder_outputs.astype(jnp.float32)

    # Batch tiling: TB rows per grid step (pad B up to a multiple of TB).
    TB = max(1, min(block_b, B))
    nb = -(-B // TB)                                          # cdiv(B, TB)
    Bp = nb * TB
    if Bp != B:
        pad = Bp - B
        hproj = jnp.pad(hproj, ((0, pad), (0, 0)))
        enc = jnp.pad(enc, ((0, pad), (0, 0), (0, 0)))

    out2d = pl.pallas_call(
        _attention_kernel,
        out_shape=jax.ShapeDtypeStruct((Bp, H), jnp.float32),
        grid_spec=pltpu.PrefetchScalarGridSpec(
            num_scalar_prefetch=0,
            grid=(nb,),
            in_specs=[
                pl.BlockSpec((TB, H), lambda b: (b, 0)),        # hidden projection
                pl.BlockSpec((TB, S, H), lambda b: (b, 0, 0)),  # encoder outputs
                pl.BlockSpec((H, H), lambda b: (0, 0)),         # W2^T (resident)
                pl.BlockSpec((1, H), lambda b: (0, 0)),         # v weight (resident)
            ],
            out_specs=pl.BlockSpec((TB, H), lambda b: (b, 0)),
        ),
        compiler_params=pltpu.CompilerParams(
            dimension_semantics=("parallel",)),
    )(hproj, enc, w2_t, v_2d)

    # Restore the PyTorch (B, 1, H) context shape (free reshape in the wrapper).
    return out2d[:B].reshape(B, 1, H)


def attention_ref(hidden, encoder_outputs, wa, ba, vw):
    """Pure-JAX reference mirroring the PyTorch forward."""
    B, H = hidden.shape
    S = encoder_outputs.shape[1]
    h = jnp.broadcast_to(hidden[:, None, :], (B, S, H))
    cat = jnp.concatenate([h, encoder_outputs], axis=2)          # (B, S, 2H)
    energy = jnp.tanh(cat @ wa.T + ba)                           # (B, S, H)
    scores = (energy @ vw.T)[..., 0]                             # (B, S)
    attn = jax.nn.softmax(scores, axis=1)                        # (B, S)
    ctx = jnp.einsum("bs,bsh->bh", attn, encoder_outputs)[:, None, :]
    return ctx


if __name__ == "__main__":
    B, S, H = 2, 8, 32

    key = jax.random.PRNGKey(0)
    k_hid, k_enc, k_wa, k_ba, k_v = jax.random.split(key, 5)

    hidden = jax.random.normal(k_hid, (B, H), dtype=jnp.float32)
    encoder_outputs = jax.random.normal(k_enc, (B, S, H), dtype=jnp.float32)

    # Deterministic parameter init (nn.Linear shapes: attn=(H, 2H)+bias(H), v=(1, H))
    bound_a = 1.0 / jnp.sqrt(2.0 * H)
    bound_v = 1.0 / jnp.sqrt(1.0 * H)
    wa = jax.random.uniform(k_wa, (H, 2 * H), jnp.float32, -bound_a, bound_a)
    ba = jax.random.uniform(k_ba, (H,), jnp.float32, -bound_a, bound_a)
    vw = jax.random.uniform(k_v, (1, H), jnp.float32, -bound_v, bound_v)

    out = attention_pallas(hidden, encoder_outputs, wa, ba, vw)
    out = jax.block_until_ready(out)

    ref = attention_ref(hidden, encoder_outputs, wa, ba, vw)
    assert out.shape == (B, 1, H), out.shape
    # Tolerance accounts for the approximate (EUP) reciprocal in the softmax.
    assert jnp.allclose(out, ref, atol=1e-3, rtol=1e-3), "mismatch vs reference"

    print("KERNEL_OK")
</pallas_src>

<mosaic_0001>
module attributes {stable_mosaic.version = 11 : i64} {
  func.func @_attention_kernel(%arg0: i32, %arg1: memref<2x32xf32, #tpu.memory_space<vmem>>, %arg2: memref<2x8x32xf32, #tpu.memory_space<vmem>>, %arg3: memref<32x32xf32, #tpu.memory_space<vmem>>, %arg4: memref<1x32xf32, #tpu.memory_space<vmem>>, %arg5: memref<2x32xf32, #tpu.memory_space<vmem>>) attributes {dimension_semantics = [#tpu.dimension_semantics<parallel>], iteration_bounds = array<i64: 1>, scalar_prefetch = 0 : i64, scratch_operands = 0 : i64, tpu.core_type = #tpu.core_type<tc>, window_params = [{transform_indices = @transform_0, window_bounds = array<i64: 2, 32>}, {transform_indices = @transform_1, window_bounds = array<i64: 2, 8, 32>}, {pipeline_mode = #tpu.pipeline_mode<synchronous>, transform_indices = @transform_2, window_bounds = array<i64: 32, 32>}, {pipeline_mode = #tpu.pipeline_mode<synchronous>, transform_indices = @transform_3, window_bounds = array<i64: 1, 32>}, {transform_indices = @transform_4, window_bounds = array<i64: 2, 32>}]} {
    %c0 = arith.constant 0 : index
    %c0_0 = arith.constant 0 : index
    %c0_1 = arith.constant 0 : index
    %0 = vector.load %arg2[%c0, %c0_0, %c0_1] : memref<2x8x32xf32, #tpu.memory_space<vmem>>, vector<2x8x32xf32>
    %1 = vector.shape_cast %0 : vector<2x8x32xf32> to vector<16x32xf32>
    %c0_2 = arith.constant 0 : index
    %c0_3 = arith.constant 0 : index
    %2 = vector.load %arg3[%c0_2, %c0_3] : memref<32x32xf32, #tpu.memory_space<vmem>>, vector<32x32xf32>
    %cst = arith.constant dense<0.000000e+00> : vector<16x32xf32>
    %3 = tpu.matmul %1, %2, %cst {dimension_numbers = #tpu.dot_dimension_numbers<[1], [0], [0], [1], [0, 0, 1, 1], [], []>} : vector<16x32xf32>, vector<32x32xf32>, vector<16x32xf32> -> vector<16x32xf32>
    %4 = vector.shape_cast %3 : vector<16x32xf32> to vector<2x8x32xf32>
    %c0_4 = arith.constant 0 : index
    %c0_5 = arith.constant 0 : index
    %5 = vector.load %arg1[%c0_4, %c0_5] : memref<2x32xf32, #tpu.memory_space<vmem>>, vector<2x32xf32>
    %6 = vector.shape_cast %5 : vector<2x32xf32> to vector<2x1x32xf32>
    %7 = vector.broadcast %6 : vector<2x1x32xf32> to vector<2x8x32xf32>
    %8 = arith.addf %4, %7 : vector<2x8x32xf32>
    %9 = math.tanh %8 : vector<2x8x32xf32>
    %c0_6 = arith.constant 0 : index
    %c0_7 = arith.constant 0 : index
    %10 = vector.load %arg4[%c0_6, %c0_7] : memref<1x32xf32, #tpu.memory_space<vmem>>, vector<1x32xf32>
    %11 = vector.shape_cast %10 : vector<1x32xf32> to vector<1x1x32xf32>
    %12 = vector.broadcast %11 : vector<1x1x32xf32> to vector<2x8x32xf32>
    %13 = arith.mulf %9, %12 : vector<2x8x32xf32>
    %cst_8 = arith.constant dense<0.000000e+00> : vector<2x8xf32>
    %14 = vector.multi_reduction <add>, %13, %cst_8 [2] : vector<2x8x32xf32> to vector<2x8xf32>
    %cst_9 = arith.constant dense<0xFF800000> : vector<2xf32>
    %15 = vector.multi_reduction <maximumf>, %14, %cst_9 [1] : vector<2x8xf32> to vector<2xf32>
    %16 = vector.shape_cast %15 : vector<2xf32> to vector<2x1xf32>
    %17 = vector.broadcast %16 : vector<2x1xf32> to vector<2x8xf32>
    %18 = arith.subf %14, %17 : vector<2x8xf32>
    %19 = math.exp %18 : vector<2x8xf32>
    %cst_10 = arith.constant dense<0.000000e+00> : vector<2xf32>
    %20 = vector.multi_reduction <add>, %19, %cst_10 [1] : vector<2x8xf32> to vector<2xf32>
    %21 = vector.shape_cast %20 : vector<2xf32> to vector<2x1xf32>
    %22 = tpu.reciprocal %21 {approx = true} : vector<2x1xf32> -> vector<2x1xf32>
    %23 = vector.broadcast %22 : vector<2x1xf32> to vector<2x8xf32>
    %24 = arith.mulf %19, %23 : vector<2x8xf32>
    %25 = vector.shape_cast %24 : vector<2x8xf32> to vector<2x8x1xf32>
    %26 = vector.broadcast %25 : vector<2x8x1xf32> to vector<2x8x32xf32>
    %27 = arith.mulf %26, %0 : vector<2x8x32xf32>
    %cst_11 = arith.constant dense<0.000000e+00> : vector<2x32xf32>
    %28 = vector.multi_reduction <add>, %27, %cst_11 [1] : vector<2x8x32xf32> to vector<2x32xf32>
    %c0_12 = arith.constant 0 : index
    %c0_13 = arith.constant 0 : index
    %29 = vector.load %arg5[%c0_12, %c0_13] : memref<2x32xf32, #tpu.memory_space<vmem>>, vector<2x32xf32>
    tpu.vector_store %arg5[%c0_12, %c0_13], %28 {strides = array<i32>} : memref<2x32xf32, #tpu.memory_space<vmem>>, vector<2x32xf32>,
    return
  }
  func.func @transform_0(%arg0: i32) -> (i32, i32) {
    %c0_i32 = arith.constant 0 : i32
    %c0_i32_0 = arith.constant 0 : i32
    return %arg0, %c0_i32 : i32, i32
  }
  func.func @transform_1(%arg0: i32) -> (i32, i32, i32) {
    %c0_i32 = arith.constant 0 : i32
    %c0_i32_0 = arith.constant 0 : i32
    %c0_i32_1 = arith.constant 0 : i32
    return %arg0, %c0_i32, %c0_i32_0 : i32, i32, i32
  }
  func.func @transform_2(%arg0: i32) -> (i32, i32) {
    %c0_i32 = arith.constant 0 : i32
    %c0_i32_0 = arith.constant 0 : i32
    %c0_i32_1 = arith.constant 0 : i32
    return %c0_i32, %c0_i32_0 : i32, i32
  }
  func.func @transform_3(%arg0: i32) -> (i32, i32) {
    %c0_i32 = arith.constant 0 : i32
    %c0_i32_0 = arith.constant 0 : i32
    %c0_i32_1 = arith.constant 0 : i32
    return %c0_i32, %c0_i32_0 : i32, i32
  }
  func.func @transform_4(%arg0: i32) -> (i32, i32) {
    %c0_i32 = arith.constant 0 : i32
    %c0_i32_0 = arith.constant 0 : i32
    return %arg0, %c0_i32 : i32, i32
  }
}

</mosaic_0001>

<bundles_post_ra>
// kernel: tpu_custom_call.1
= control target key start
LH: loop header
LB: loop body
LE: loop exit
PB: predicated region body
PF: predicated region fallthrough
CT: control target
= control target key end

     0   :  { %9 = vsyncpa [#allocation3], 0  ;;  %s517_s0 = inlined_call_operand.hbm [shape: f32[2,32], index: 0, kind: input, shape index: {}]   ;;  %s518_s1 = inlined_call_operand.hbm [shape: f32[2,8,32], index: 1, kind: input, shape index: {}]   ;;  %s519_s2 = inlined_call_operand.hbm [shape: f32[32,32], index: 2, kind: input, shape index: {}]   ;;  %s520_s3 = inlined_call_operand.vmem [shape: f32[1,32], index: 3, kind: input, shape index: {}]   ;;  %s521_s4 = inlined_call_operand.hbm [shape: f32[2,32], index: 4, kind: output, shape index: {}]  }
   0x1   :  { %10 = vsyncpa [#allocation6], 0 }
   0x2   :  { %11 = vsyncpa [#allocation4], 0  ;;  %s444_s15 = smov [#allocation5]  }
   0x3   :  { %s27_s16 = sshll.u32 %s444_s15, 4  ;;  %s28_s16 = int_to_ptr.vmem [resolvable:$true] %s27_s16 }
   0x4   :  { %s366_s17 = scalar_lea.vmem %s28_s16, 256  ;;  %p371_p1 = scmp.lt.s32.totalorder %s28_s16, %s28_s16 }
   0x5   :  { %p367_p0 = scmp.ne.s32.totalorder %s28_s16, %s366_s17  ;;  %p372_p2 = scmp.lt.s32.totalorder %s366_s17, %s366_s17 }
   0x7   :  { %p373_p3 = por %p372_p2, %p371_p1 }
   0x9   :  { %p374_p4 = pnand %p373_p3, %p367_p0 }
   0xb   :  { %377 = shalt.err (!%p374_p4)
}
   0xc   :  { %s445_s18 = smov 128   ;;  %s446_s19 = smov 8  }
   0xd   :  { %33 = dma.hbm_to_vmem [thread:$0]  %s518_s1, 256, %s28_s16, [#allocation6], %s445_s18, %s445_s18, %s446_s19  }
   0xe   :  { %s447_s22 = smov [#allocation2]   ;;  %s448_s24 = smov [#allocation7]  }
   0xf   :  { %s18_s23 = sshll.u32 %s447_s22, 4  ;;  %s39_s25 = sshll.u32 %s448_s24, 4  ;;  %s19_s23 = int_to_ptr.vmem [resolvable:$true] %s18_s23  ;;  %s40_s25 = int_to_ptr.vmem [resolvable:$true] %s39_s25 }
  0x10   :  { %s386_s26 = scalar_lea.vmem %s19_s23, 32  ;;  %p391_p6 = scmp.lt.s32.totalorder %s19_s23, %s19_s23 }
  0x11   :  { %p387_p5 = scmp.ne.s32.totalorder %s19_s23, %s386_s26  ;;  %p392_p7 = scmp.lt.s32.totalorder %s386_s26, %s386_s26 }
  0x13   :  { %p393_p8 = por %p392_p7, %p391_p6 }
  0x15   :  { %p394_p9 = pnand %p393_p8, %p387_p5 }
  0x17   :  { %397 = shalt.err (!%p394_p9)
}
  0x18   :  { %21 = dma.hbm_to_vmem [thread:$0]  %s517_s0, 32, %s19_s23, [#allocation3]  }
  0x19   :  { %s406_s29 = scalar_lea.vmem %s40_s25, 512  ;;  %p411_p11 = scmp.lt.s32.totalorder %s40_s25, %s40_s25 }
  0x1a   :  { %p407_p10 = scmp.ne.s32.totalorder %s40_s25, %s406_s29  ;;  %p412_p12 = scmp.lt.s32.totalorder %s406_s29, %s406_s29 }
  0x1c   :  { %p413_p13 = por %p412_p12, %p411_p11 }
  0x1e   :  { %p414_p0 = pnand %p413_p13, %p407_p10 }
  0x20   :  { %417 = shalt.err (!%p414_p0)
}
  0x21   :  { %45 = dma.hbm_to_vmem [thread:$0]  %s519_s2, 512, %s40_s25, [#allocation6], %s445_s18, %s445_s18, %s446_s19  }
  0x22   :  { %438 = dma.done.wait [#allocation3], 32  }
  0x23   :  { %439 = vsyncadd [#allocation3], 4294967264 }
  0x24   :  { %440 = dma.done.wait [#allocation6], 768  }
  0x25   :  { %441 = vsyncadd [#allocation6], 4294966528  ;;  %vm63_vm0 = vcmask 261120   ;;  %v62_v0 = vld [vmem:[#allocation7 + $0x18] sm:$0xff]  ;;  %v61_v1 = vld [vmem:[#allocation7 + $0x10] sm:$0xff]  ;;  %v158_v8 = vlaneseq  ;;  %vm210_vm1 = vcmask 1041409  }
  0x26   :  { %327 = vmatprep.subr.mxu0 %v62_v0  ;;  %v486_v2 = vld [vmem:[#allocation5] sm:$0xff]  ;;  %v60_v3 = vld [vmem:[#allocation7 + $0x8] sm:$0xff]  ;;  %v59_v4 = vld [vmem:[#allocation7] sm:$0xff]  ;;  %v449_v6 = vmov 1966171168   ;;  %vm213_vm2 = vcmask 58368  }
  0x27   :  { %328 = vmatpush3.msra.mxu0 %v62_v0  ;;  %335 = vmatprep.mubr.msk.f32.mxu0 %vm63_vm0, %v486_v2  ;;  %v490_v5 = vld [vmem:[#allocation5 + $0x8] sm:$0xff]  ;;  %v156_v7 = vunpack.c.l.s4 %v449_v6  ;;  %v494_v10 = vshrl.u32 %v158_v8, 7  ;;  %v319_v11 = vld.sshfl [vmem:[#allocation2] sm:$0x11 pattern:$0x75316420] }
  0x28   :  { %329 = vmatprep.subr.mxu0 %v61_v1  ;;  %v154_v12 = vcombine.high %v319_v11, %v319_v11  ;;  %v320_v25 = vld [vmem:[%s520_s3] ss:$0 sm:$0xff]  ;;  %v201_v30 = vand.u32 127, %v158_v8  ;;  %v450_v38 = vmov 0   ;;  %s451_s3 = smov [#allocation8]   ;;  %vm299_vm3 = vcmask 254976  }
  0x29   :  { %330 = vmatpush3.msra.mxu0 %v61_v1  ;;  %v157_v9 = vunpack.c.0.s8 %v156_v7  ;;  %v171_v15 = vsub.s32 0, %v494_v10  ;;  %347 = vset.pattern.permute.xlu0 %v450_v38  ;;  %v224_v39 = vsub.s32 1, %v494_v10  ;;  %s307_s5 = sshll.u32 %s451_s3, 4  ;;  %s308_s5 = int_to_ptr.vmem [resolvable:$true] %s307_s5 }
  0x2a   :  { %331 = vmatprep.subr.mxu0 %v60_v3  ;;  %v204_v32 = vsub.s32 %v201_v30, %v494_v10  ;;  %346 = vset.pattern.permute.xlu1 %v450_v38  ;;  %s418_s6 = scalar_lea.vmem %s308_s5, 32  ;;  %p423_p2 = scmp.lt.s32.totalorder %s308_s5, %s308_s5 }
  0x2b   :  { %332 = vmatpush3.msra.mxu0 %v60_v3  ;;  %v160_v13 = vsub.s32 %v157_v9, %v494_v10  ;;  %p419_p1 = scmp.ne.s32.totalorder %s308_s5, %s418_s6  ;;  %p424_p3 = scmp.lt.s32.totalorder %s418_s6, %s418_s6 }
  0x2c   :  { %333 = vmatprep.subr.mxu0 %v59_v4 }
  0x2d   :  { %334 = vmatpush3.msra.mxu0 %v59_v4  ;;  %v168_v14 = vrot.slane %v154_v12, %v160_v13  ;;  %v161_v16 = vrot.slane %v319_v11, %v160_v13  ;;  %p425_p4 = por %p424_p3, %p423_p2 }
  0x2e   :  { %336 = vmatmul.mubr.msk.f32.vlgmr.msra.gmra.mxu0 %vm63_vm0, %v490_v5 }
  0x2f   :  { %v176_v17 = vrot.slane %v168_v14, %v171_v15  ;;  %v172_v18 = vrot.slane %v161_v16, %v171_v15  ;;  %p426_p5 = pnand %p425_p4, %p419_p1 }
  0xee   :  { %v337_v19 = vpop.f32.mrf.mxu0 }
  0xef   :  { %v180_v20 = vadd.f32 %v337_v19, %v176_v17 }
  0xf0   :  { %v136_v21 = vpop.f32.mrf.mxu0 }
  0xf1   :  { %v179_v22 = vadd.f32 %v172_v18, %v136_v21  ;;  %348 = vtanh.f32 %v180_v20 }
  0xf3   :  { %350 = vtanh.f32 %v179_v22 }
  0xfe   :  { %v349_v23 = vpop.eup %348 }
  0xff   :  { %v191_v28 = vmul.f32 %v349_v23, %v320_v25 }
 0x100   :  { %v351_v24 = vpop.eup %350 }
 0x101   :  { %v190_v26 = vmul.f32 %v351_v24, %v320_v25  ;;  %v195_v29 = vsel %vm63_vm0, %v191_v28, 0.0 }
 0x103   :  { %v192_v27 = vsel %vm63_vm0, %v190_v26, 0.0 }
 0x104   :  { %193 = vadd.xlane.f32.xlu0 %v192_v27 }
 0x108   :  { %196 = vadd.xlane.f32.xlu0 %v195_v29 }
 0x18d   :  { %v194_v31 = vpop.xlane.xlu0 %193 }
 0x18e   :  { %v205_v34 = vrot.slane %v194_v31, %v204_v32 }
 0x191   :  { %v197_v33 = vpop.xlane.xlu0 %196 }
 0x192   :  { %v209_v35 = vrot.slane %v197_v33, %v204_v32 }
 0x194   :  { %v211_v36 = vsel %vm210_vm1, %v209_v35, %v205_v34 }
 0x195   :  { %v214_v37 = vsel %vm213_vm2, %v211_v36, -inf }
 0x196   :  { %215 = vmax.xlane.f32.xlu1 %v214_v37 }
 0x21f   :  { %v216_v40 = vpop.xlane.xlu1 %215 }
 0x220   :  { %v221_v41 = vrot.slane %v216_v40, %v171_v15  ;;  %v225_v42 = vrot.slane %v216_v40, %v224_v39 }
 0x222   :  { %v228_v43 = vsub.f32 %v194_v31, %v221_v41  ;;  %v229_v44 = vsub.f32 %v197_v33, %v225_v42 }
 0x224   :  { %v230_v45 = vmul.f32 1.442695, %v228_v43  ;;  %v232_v46 = vmul.f32 1.442695, %v229_v44 }
 0x226   :  { %352 = vpow2.f32 %v230_v45 }
 0x227   :  { %354 = vpow2.f32 %v232_v46 }
 0x233   :  { %v353_v47 = vpop.eup %352 }
 0x234   :  { %v355_v48 = vpop.eup %354  ;;  %237 = vperm.xlu1 %346, %v353_v47  }
 0x235   :  { %240 = vperm.xlu0 %347, %v355_v48  }
 0x2af   :  { %v238_v49 = vpop.permute.xlu1 %237 }
 0x2b0   :  { %v241_v50 = vpop.permute.xlu0 %240  ;;  %v245_v51 = vrot.slane %v238_v49, %v204_v32 }
 0x2b1   :  { %v249_v52 = vrot.slane %v241_v50, %v204_v32 }
 0x2b3   :  { %v250_v53 = vsel %vm210_vm1, %v249_v52, %v245_v51 }
 0x2b4   :  { %v252_v54 = vsel %vm213_vm2, %v250_v53, 0.0 }
 0x2b5   :  { %253 = vadd.xlane.f32.xlu1 %v252_v54 }
 0x33e   :  { %v254_v55 = vpop.xlane.xlu1 %253 }
 0x33f   :  { %356 = vrcp.f32 %v254_v55 }
 0x34c   :  { %v357_v56 = vpop.eup %356 }
 0x34d   :  { %v260_v57 = vrot.slane %v357_v56, %v171_v15  ;;  %v264_v59 = vrot.slane %v357_v56, %v224_v39 }
 0x34f   :  { %v267_v58 = vmul.f32 %v353_v47, %v260_v57  ;;  %v268_v60 = vmul.f32 %v355_v48, %v264_v59 }
 0x351   :  { %271 = vperm.xlu0 %347, %v267_v58  }
 0x355   :  { %276 = vperm.xlu0 %347, %v268_v60  }
 0x3cc   :  { %v272_v61 = vpop.permute.xlu0 %271 }
 0x3cd   :  { %v279_v62 = vmul.f32 %v272_v61, %v486_v2 }
 0x3cf   :  { %v281_v63 = vsel %vm63_vm0, %v279_v62, 0.0 }
 0x3d0   :  { %v282_v0 = vrot.slane %v281_v63, 4  ;;  %v277_v1 = vpop.permute.xlu0 %276 }
 0x3d1   :  { %v280_v3 = vmul.f32 %v277_v1, %v490_v5 }
 0x3d2   :  { %v283_v4 = vadd.f32 %v282_v0, %v281_v63 }
 0x3d3   :  { %v288_v6 = vsel %vm63_vm0, %v280_v3, 0.0 }
 0x3d4   :  { %v284_v7 = vrot.slane %v283_v4, 2  ;;  %v289_v8 = vrot.slane %v288_v6, 4 }
 0x3d6   :  { %v285_v9 = vadd.f32 %v284_v7, %v283_v4  ;;  %v290_v10 = vadd.f32 %v289_v8, %v288_v6 }
 0x3d8   :  { %v291_v11 = vrot.slane %v290_v10, 2  ;;  %v286_v12 = vrot.slane %v285_v9, 1 }
 0x3da   :  { %v292_v13 = vadd.f32 %v291_v11, %v290_v10  ;;  %v287_v2 = vadd.f32 %v286_v12, %v285_v9 }
 0x3dc   :  { %v293_v14 = vrot.slane %v292_v13, 1 }
 0x3de   :  { %v294_v15 = vadd.f32 %v293_v14, %v292_v13 }
 0x3e0   :  { %v297_v16 = vsel %vm210_vm1, %v294_v15, %v287_v2 }
 0x3e1   :  { %300 = vst.msk [vmem:[#allocation8] sm:$0x3] %vm299_vm3, %v297_v16 }
 0x3e2   :  { %429 = shalt.err (!%p426_p5)
}
 0x3e3   :  { %310 = dma.vmem_to_hbm [thread:$0]  %s308_s5, 32, %s521_s4, [#allocation4]  }
 0x3e4   :  { %442 = dma.done.wait [#allocation4], 32  }
 0x3e5   :  { %443 = vsyncadd [#allocation4], 4294967264 }
 0x3e6   :  { %314 = vsyncpa [#allocation3], 1 }
 0x3e7   :  { %315 = vsyncpa [#allocation6], 1 }
 0x3e8   :  { %316 = vsyncpa [#allocation4], 1 }

</bundles_post_ra>
